<compile_context>
chip_gen: v6e
topology: v6e:2x2x1
jax: 0.10.0
libtpu: 0.0.40
codegen_flags: <defaults>
</compile_context>

<pallas_src>
import math
from functools import partial

import jax
import jax.numpy as jnp
from jax.experimental import pallas as pl
from jax.experimental.pallas import tpu as pltpu

EMBED_DIM = 32            # E
NUM_HEADS = 4             # H
HEAD_DIM = EMBED_DIM // NUM_HEADS
SEQ_LEN = 8               # S
BATCH = 2                 # B
NUM_LAYERS = 4
FFN_DIM = EMBED_DIM * 4   # 128
LN_EPS = 1e-5


def _layernorm(x, gamma, beta):
    mean = jnp.mean(x, axis=-1, keepdims=True)
    var = jnp.mean((x - mean) ** 2, axis=-1, keepdims=True)
    return (x - mean) * jax.lax.rsqrt(var + LN_EPS) * gamma + beta


def encoder_layer_kernel(x_ref, w_attn_ref, w1_ref, w2_ref, vec_ref, o_ref,
                         *, batch, seq, num_heads):
    """One fused encoder layer on a single VMEM-resident (B*S, E) slab.

    x_ref      : (B*S, E)      activations
    w_attn_ref : (E, 4E)       [Wq*1/sqrt(Dh) | Wk | Wv | Wo]
    w1_ref     : (E, 4E)       FFN up-projection
    w2_ref     : (4E, E)       FFN down-projection
    vec_ref    : (8, 4E)       packed small vectors:
                   row 0: [bq*scale | bk | bv | bo]
                   row 1: b1 (FFN hidden bias, 4E lanes)
                   row 2: b2 (lanes 0:E)
                   row 3/4: ln1 gamma / beta (lanes 0:E)
                   row 5/6: ln2 gamma / beta (lanes 0:E)
                   row 7: zero pad
    """
    B, S, H = batch, seq, num_heads
    BS, E = x_ref.shape
    Dh = E // H

    x = x_ref[...]                         # (BS, E)   f32
    w_attn = w_attn_ref[...]               # (E, 4E)
    vec = vec_ref[...]                     # (8, 4E)   one vreg of packed vectors

    # ---- fused Q|K|V (|Wo-junk) projection: one dense MXU pass ---------------
    # Lanes 0:3E are Q|K|V (with biases); lanes 3E:4E are x@Wo+bo and are ignored
    # (cheaper than slicing the weight before the matmul).
    xw = jnp.dot(x, w_attn, preferred_element_type=jnp.float32) + vec[0:1, :]
    qkv = xw[:, :3 * E].reshape(B, S, 3 * E)            # (B, S, 3E)

    # ---- multi-head attention: all heads stacked on one leading batch dim ----
    # 1/sqrt(Dh) is already folded into the Q columns/bias.
    q = jnp.concatenate([qkv[:, :, h * Dh:(h + 1) * Dh]
                         for h in range(H)], axis=0)                     # (H*B, S, Dh)
    k = jnp.concatenate([qkv[:, :, E + h * Dh:E + (h + 1) * Dh]
                         for h in range(H)], axis=0)                     # (H*B, S, Dh)
    v = jnp.concatenate([qkv[:, :, 2 * E + h * Dh:2 * E + (h + 1) * Dh]
                         for h in range(H)], axis=0)                     # (H*B, S, Dh)

    s = jnp.einsum('nqd,nkd->nqk', q, k,
                   preferred_element_type=jnp.float32)                   # (H*B, S, S)
    s = s - jnp.max(s, axis=-1, keepdims=True)
    p = jnp.exp(s)
    p = p * pl.reciprocal(jnp.sum(p, axis=-1, keepdims=True), approx=True)
    ctx = jnp.einsum('nqk,nkd->nqd', p, v,
                     preferred_element_type=jnp.float32)                 # (H*B, S, Dh)

    # Concat heads back onto lanes (head-major) -> ONE (BS,E)x(E,E) Wo matmul.
    ctx_cat = jnp.concatenate(
        [ctx[h * B:(h + 1) * B].reshape(BS, Dh) for h in range(H)], axis=-1)  # (BS, E)
    wo = w_attn[:, 3 * E:]                                               # (E, E)
    bo = vec[0:1, 3 * E:4 * E]                                           # (1, E)
    attn = jnp.dot(ctx_cat, wo, preferred_element_type=jnp.float32) + bo

    # ---- residual + attention LayerNorm --------------------------------------
    y1 = _layernorm(attn + x, vec[3:4, :E], vec[4:5, :E])

    # ---- FFN ------------------------------------------------------------------
    h1 = jnp.dot(y1, w1_ref[...], preferred_element_type=jnp.float32) + vec[1:2, :]
    h1 = jnp.maximum(h1, 0.0)
    h2 = jnp.dot(h1, w2_ref[...], preferred_element_type=jnp.float32) + vec[2:3, :E]

    # ---- residual + output LayerNorm ------------------------------------------
    out = _layernorm(h2 + y1, vec[5:6, :E], vec[6:7, :E])
    o_ref[...] = out.astype(o_ref.dtype)


def _vmem_spec():
    # Full-array, no grid, no pipelining scaffolding: just "live in VMEM".
    return pl.BlockSpec(memory_space=pltpu.MemorySpace.VMEM)


def encoder_layer(x2d, params, *, batch, seq, num_heads):
    BS, E = x2d.shape
    kernel = partial(encoder_layer_kernel, batch=batch, seq=seq, num_heads=num_heads)
    return pl.pallas_call(
        kernel,
        out_shape=jax.ShapeDtypeStruct((BS, E), jnp.float32),
        in_specs=[_vmem_spec()] * 5,
        out_specs=_vmem_spec(),
    )(x2d, params["w_attn"], params["w1"], params["w2"], params["vec"])


@partial(jax.jit, static_argnames=("num_layers",))
def encoder_block_forward(input_embs, params, num_layers=NUM_LAYERS):
    # The PyTorch forward recomputes the layer from `input_embs` on every iteration
    # (it never chains the previous output), so every iteration yields the identical
    # result: one fused call is exactly equivalent for any num_layers >= 1.
    if num_layers <= 0:
        return input_embs
    B, S, E = input_embs.shape
    x2d = input_embs.reshape(B * S, E)       # lane-dense 2-D slab into the kernel
    out2d = encoder_layer(x2d, params, batch=B, seq=S, num_heads=NUM_HEADS)
    return out2d.reshape(B, S, E)


def init_params(key, embed_dim=EMBED_DIM, num_heads=NUM_HEADS, ffn_dim=FFN_DIM):
    """Deterministic synthetic parameters, pre-packed for the kernel.

    PyTorch Linear stores (out, in); we pre-transpose to (in, out) for x @ W, fuse
    Wq|Wk|Wv|Wo into one (E, 4E) slab with 1/sqrt(head_dim) folded into the Q part,
    and pack all small vectors into a single (8, 4E) slab (one vreg)."""
    assert ffn_dim == 4 * embed_dim, "packing below assumes FFN_DIM == 4*EMBED_DIM"
    keys = jax.random.split(key, 12)
    head_dim = embed_dim // num_heads
    lanes = 4 * embed_dim

    def lin(kw, kb, fan_in, fan_out):
        bound = 1.0 / math.sqrt(fan_in)
        w = jax.random.uniform(kw, (fan_out, fan_in), jnp.float32, -bound, bound)
        b = jax.random.uniform(kb, (fan_out,), jnp.float32, -bound, bound)
        return w.T, b                          # (in, out), (out,)

    wq, bq = lin(keys[0], keys[1], embed_dim, embed_dim)
    wk, bk = lin(keys[2], keys[3], embed_dim, embed_dim)
    wv, bv = lin(keys[4], keys[5], embed_dim, embed_dim)
    wo, bo = lin(keys[6], keys[7], embed_dim, embed_dim)
    w1, b1 = lin(keys[8], keys[9], embed_dim, ffn_dim)
    w2, b2 = lin(keys[10], keys[11], ffn_dim, embed_dim)

    scale = 1.0 / math.sqrt(head_dim)
    w_attn = jnp.concatenate([wq * scale, wk, wv, wo], axis=1)   # (E, 4E)

    def row(v):
        return jnp.pad(v, (0, lanes - v.shape[0]))

    vec = jnp.stack([
        jnp.concatenate([bq * scale, bk, bv, bo]),        # row 0: qkv + out biases
        b1,                                               # row 1: FFN hidden bias
        row(b2),                                          # row 2: FFN out bias
        row(jnp.ones((embed_dim,), jnp.float32)),         # row 3: ln1 gamma
        row(jnp.zeros((embed_dim,), jnp.float32)),        # row 4: ln1 beta
        row(jnp.ones((embed_dim,), jnp.float32)),         # row 5: ln2 gamma
        row(jnp.zeros((embed_dim,), jnp.float32)),        # row 6: ln2 beta
        jnp.zeros((lanes,), jnp.float32),                 # row 7: pad
    ], axis=0)                                            # (8, 4E)

    return {"w_attn": w_attn, "w1": w1, "w2": w2, "vec": vec}


def reference_forward(x, params, num_layers=NUM_LAYERS):
    """Plain-JAX reference of the EncoderBlock forward (exact softmax divide)."""
    if num_layers <= 0:
        return x
    B, S, E = x.shape
    H, Dh = NUM_HEADS, E // NUM_HEADS
    w_attn, vec = params["w_attn"], params["vec"]
    wqkv, wo = w_attn[:, :3 * E], w_attn[:, 3 * E:]
    bqkv, bo = vec[0, :3 * E], vec[0, 3 * E:4 * E]
    w1, b1 = params["w1"], vec[1, :]
    w2, b2 = params["w2"], vec[2, :E]
    g1, be1 = vec[3, :E], vec[4, :E]
    g2, be2 = vec[5, :E], vec[6, :E]

    x2 = x.reshape(B * S, E)
    qkv = x2 @ wqkv + bqkv
    q = qkv[:, 0:E].reshape(B, S, H, Dh)
    k = qkv[:, E:2 * E].reshape(B, S, H, Dh)
    v = qkv[:, 2 * E:3 * E].reshape(B, S, H, Dh)
    s = jnp.einsum('bqhd,bkhd->bhqk', q, k)          # scale already folded into Wq
    p = jax.nn.softmax(s, axis=-1)
    ctx = jnp.einsum('bhqk,bkhd->bqhd', p, v).reshape(B * S, E)
    attn = ctx @ wo + bo
    y1 = _layernorm(attn + x2, g1, be1)
    h = jnp.maximum(y1 @ w1 + b1, 0.0)
    h2 = h @ w2 + b2
    out = _layernorm(h2 + y1, g2, be2)
    return out.reshape(B, S, E)


if __name__ == "__main__":
    key = jax.random.PRNGKey(0)
    k_params, k_x = jax.random.split(key)
    params = init_params(k_params)
    x = jax.random.normal(k_x, (BATCH, SEQ_LEN, EMBED_DIM), jnp.float32)

    out = encoder_block_forward(x, params)
    jax.block_until_ready(out)
    assert out.shape == (BATCH, SEQ_LEN, EMBED_DIM)
    assert bool(jnp.all(jnp.isfinite(out)))

    # Correctness vs. plain-JAX reference (loose tolerance: approx reciprocal softmax).
    ref = reference_forward(x, params)
    max_err = float(jnp.max(jnp.abs(out - ref)))
    assert max_err < 5e-2, f"max abs error vs reference: {max_err}"

    print("KERNEL_OK")
</pallas_src>

<mosaic_0001>
module attributes {stable_mosaic.version = 11 : i64} {
  func.func @encoder_layer_kernel(%arg0: memref<16x32xf32, #tpu.memory_space<vmem>>, %arg1: memref<32x128xf32, #tpu.memory_space<vmem>>, %arg2: memref<32x128xf32, #tpu.memory_space<vmem>>, %arg3: memref<128x32xf32, #tpu.memory_space<vmem>>, %arg4: memref<8x128xf32, #tpu.memory_space<vmem>>, %arg5: memref<16x32xf32, #tpu.memory_space<vmem>>) attributes {dimension_semantics = [], scalar_prefetch = 0 : i64, scratch_operands = 0 : i64, tpu.core_type = #tpu.core_type<tc>} {
    %c0 = arith.constant 0 : index
    %c0_0 = arith.constant 0 : index
    %0 = vector.load %arg0[%c0, %c0_0] : memref<16x32xf32, #tpu.memory_space<vmem>>, vector<16x32xf32>
    %c0_1 = arith.constant 0 : index
    %c0_2 = arith.constant 0 : index
    %1 = vector.load %arg1[%c0_1, %c0_2] : memref<32x128xf32, #tpu.memory_space<vmem>>, vector<32x128xf32>
    %c0_3 = arith.constant 0 : index
    %c0_4 = arith.constant 0 : index
    %2 = vector.load %arg4[%c0_3, %c0_4] : memref<8x128xf32, #tpu.memory_space<vmem>>, vector<8x128xf32>
    %cst = arith.constant dense<0.000000e+00> : vector<16x128xf32>
    %3 = tpu.matmul %0, %1, %cst {dimension_numbers = #tpu.dot_dimension_numbers<[1], [0], [0], [1], [0, 0, 1, 1], [], []>} : vector<16x32xf32>, vector<32x128xf32>, vector<16x128xf32> -> vector<16x128xf32>
    %4 = vector.extract_strided_slice %2 {offsets = [0, 0], sizes = [1, 128], strides = [1, 1]} : vector<8x128xf32> to vector<1x128xf32>
    %5 = vector.broadcast %4 : vector<1x128xf32> to vector<16x128xf32>
    %6 = arith.addf %3, %5 : vector<16x128xf32>
    %7 = vector.extract_strided_slice %6 {offsets = [0, 0], sizes = [16, 96], strides = [1, 1]} : vector<16x128xf32> to vector<16x96xf32>
    %8 = vector.shape_cast %7 : vector<16x96xf32> to vector<2x8x96xf32>
    %9 = vector.extract_strided_slice %8 {offsets = [0, 0, 0], sizes = [2, 8, 8], strides = [1, 1, 1]} : vector<2x8x96xf32> to vector<2x8x8xf32>
    %10 = vector.extract_strided_slice %8 {offsets = [0, 0, 8], sizes = [2, 8, 8], strides = [1, 1, 1]} : vector<2x8x96xf32> to vector<2x8x8xf32>
    %11 = vector.extract_strided_slice %8 {offsets = [0, 0, 16], sizes = [2, 8, 8], strides = [1, 1, 1]} : vector<2x8x96xf32> to vector<2x8x8xf32>
    %12 = vector.extract_strided_slice %8 {offsets = [0, 0, 24], sizes = [2, 8, 8], strides = [1, 1, 1]} : vector<2x8x96xf32> to vector<2x8x8xf32>
    %13 = tpu.concatenate %9, %10, %11, %12 in 0 : vector<2x8x8xf32>, vector<2x8x8xf32>, vector<2x8x8xf32>, vector<2x8x8xf32> -> vector<8x8x8xf32>
    %14 = vector.extract_strided_slice %8 {offsets = [0, 0, 32], sizes = [2, 8, 8], strides = [1, 1, 1]} : vector<2x8x96xf32> to vector<2x8x8xf32>
    %15 = vector.extract_strided_slice %8 {offsets = [0, 0, 40], sizes = [2, 8, 8], strides = [1, 1, 1]} : vector<2x8x96xf32> to vector<2x8x8xf32>
    %16 = vector.extract_strided_slice %8 {offsets = [0, 0, 48], sizes = [2, 8, 8], strides = [1, 1, 1]} : vector<2x8x96xf32> to vector<2x8x8xf32>
    %17 = vector.extract_strided_slice %8 {offsets = [0, 0, 56], sizes = [2, 8, 8], strides = [1, 1, 1]} : vector<2x8x96xf32> to vector<2x8x8xf32>
    %18 = tpu.concatenate %14, %15, %16, %17 in 0 : vector<2x8x8xf32>, vector<2x8x8xf32>, vector<2x8x8xf32>, vector<2x8x8xf32> -> vector<8x8x8xf32>
    %19 = vector.extract_strided_slice %8 {offsets = [0, 0, 64], sizes = [2, 8, 8], strides = [1, 1, 1]} : vector<2x8x96xf32> to vector<2x8x8xf32>
    %20 = vector.extract_strided_slice %8 {offsets = [0, 0, 72], sizes = [2, 8, 8], strides = [1, 1, 1]} : vector<2x8x96xf32> to vector<2x8x8xf32>
    %21 = vector.extract_strided_slice %8 {offsets = [0, 0, 80], sizes = [2, 8, 8], strides = [1, 1, 1]} : vector<2x8x96xf32> to vector<2x8x8xf32>
    %22 = vector.extract_strided_slice %8 {offsets = [0, 0, 88], sizes = [2, 8, 8], strides = [1, 1, 1]} : vector<2x8x96xf32> to vector<2x8x8xf32>
    %23 = tpu.concatenate %19, %20, %21, %22 in 0 : vector<2x8x8xf32>, vector<2x8x8xf32>, vector<2x8x8xf32>, vector<2x8x8xf32> -> vector<8x8x8xf32>
    "tpu.trace_start"() <{level = 10 : i32, message = "nqd,nkd->nqk"}> : () -> ()
    %cst_5 = arith.constant dense<0.000000e+00> : vector<8x8x8xf32>
    %24 = tpu.matmul %13, %18, %cst_5 {dimension_numbers = #tpu.dot_dimension_numbers<[2], [2], [1], [1], [0, 0, 0, 1, 1, 1], [0], [0]>} : vector<8x8x8xf32>, vector<8x8x8xf32>, vector<8x8x8xf32> -> vector<8x8x8xf32>
    "tpu.trace_stop"() : () -> ()
    %cst_6 = arith.constant dense<0xFF800000> : vector<8x8xf32>
    %25 = vector.multi_reduction <maximumf>, %24, %cst_6 [2] : vector<8x8x8xf32> to vector<8x8xf32>
    %26 = vector.shape_cast %25 : vector<8x8xf32> to vector<8x8x1xf32>
    %27 = vector.broadcast %26 : vector<8x8x1xf32> to vector<8x8x8xf32>
    %28 = arith.subf %24, %27 : vector<8x8x8xf32>
    %29 = math.exp %28 : vector<8x8x8xf32>
    %cst_7 = arith.constant dense<0.000000e+00> : vector<8x8xf32>
    %30 = vector.multi_reduction <add>, %29, %cst_7 [2] : vector<8x8x8xf32> to vector<8x8xf32>
    %31 = vector.shape_cast %30 : vector<8x8xf32> to vector<8x8x1xf32>
    %32 = tpu.reciprocal %31 {approx = true} : vector<8x8x1xf32> -> vector<8x8x1xf32>
    %33 = vector.broadcast %32 : vector<8x8x1xf32> to vector<8x8x8xf32>
    %34 = arith.mulf %29, %33 : vector<8x8x8xf32>
    "tpu.trace_start"() <{level = 10 : i32, message = "nqk,nkd->nqd"}> : () -> ()
    %cst_8 = arith.constant dense<0.000000e+00> : vector<8x8x8xf32>
    %35 = tpu.matmul %34, %23, %cst_8 {dimension_numbers = #tpu.dot_dimension_numbers<[2], [1], [1], [2], [0, 0, 0, 1, 1, 2], [0], [0]>} : vector<8x8x8xf32>, vector<8x8x8xf32>, vector<8x8x8xf32> -> vector<8x8x8xf32>
    "tpu.trace_stop"() : () -> ()
    %36 = vector.extract_strided_slice %35 {offsets = [0, 0, 0], sizes = [2, 8, 8], strides = [1, 1, 1]} : vector<8x8x8xf32> to vector<2x8x8xf32>
    %37 = vector.shape_cast %36 : vector<2x8x8xf32> to vector<16x8xf32>
    %38 = vector.extract_strided_slice %35 {offsets = [2, 0, 0], sizes = [2, 8, 8], strides = [1, 1, 1]} : vector<8x8x8xf32> to vector<2x8x8xf32>
    %39 = vector.shape_cast %38 : vector<2x8x8xf32> to vector<16x8xf32>
    %40 = vector.extract_strided_slice %35 {offsets = [4, 0, 0], sizes = [2, 8, 8], strides = [1, 1, 1]} : vector<8x8x8xf32> to vector<2x8x8xf32>
    %41 = vector.shape_cast %40 : vector<2x8x8xf32> to vector<16x8xf32>
    %42 = vector.extract_strided_slice %35 {offsets = [6, 0, 0], sizes = [2, 8, 8], strides = [1, 1, 1]} : vector<8x8x8xf32> to vector<2x8x8xf32>
    %43 = vector.shape_cast %42 : vector<2x8x8xf32> to vector<16x8xf32>
    %44 = tpu.concatenate %37, %39, %41, %43 in 1 : vector<16x8xf32>, vector<16x8xf32>, vector<16x8xf32>, vector<16x8xf32> -> vector<16x32xf32>
    %45 = vector.extract_strided_slice %1 {offsets = [0, 96], sizes = [32, 32], strides = [1, 1]} : vector<32x128xf32> to vector<32x32xf32>
    %46 = vector.extract_strided_slice %2 {offsets = [0, 96], sizes = [1, 32], strides = [1, 1]} : vector<8x128xf32> to vector<1x32xf32>
    %cst_9 = arith.constant dense<0.000000e+00> : vector<16x32xf32>
    %47 = tpu.matmul %44, %45, %cst_9 {dimension_numbers = #tpu.dot_dimension_numbers<[1], [0], [0], [1], [0, 0, 1, 1], [], []>} : vector<16x32xf32>, vector<32x32xf32>, vector<16x32xf32> -> vector<16x32xf32>
    %48 = vector.broadcast %46 : vector<1x32xf32> to vector<16x32xf32>
    %49 = arith.addf %47, %48 : vector<16x32xf32>
    %50 = arith.addf %49, %0 : vector<16x32xf32>
    %51 = vector.extract_strided_slice %2 {offsets = [3, 0], sizes = [1, 32], strides = [1, 1]} : vector<8x128xf32> to vector<1x32xf32>
    %52 = vector.extract_strided_slice %2 {offsets = [4, 0], sizes = [1, 32], strides = [1, 1]} : vector<8x128xf32> to vector<1x32xf32>
    %cst_10 = arith.constant dense<0.000000e+00> : vector<16xf32>
    %53 = vector.multi_reduction <add>, %50, %cst_10 [1] : vector<16x32xf32> to vector<16xf32>
    %54 = vector.shape_cast %53 : vector<16xf32> to vector<16x1xf32>
    %cst_11 = arith.constant 3.200000e+01 : f32
    %55 = vector.broadcast %cst_11 : f32 to vector<16x1xf32>
    %56 = arith.divf %54, %55 : vector<16x1xf32>
    %57 = vector.broadcast %56 : vector<16x1xf32> to vector<16x32xf32>
    %58 = arith.subf %50, %57 : vector<16x32xf32>
    %59 = arith.mulf %58, %58 : vector<16x32xf32>
    %cst_12 = arith.constant dense<0.000000e+00> : vector<16xf32>
    %60 = vector.multi_reduction <add>, %59, %cst_12 [1] : vector<16x32xf32> to vector<16xf32>
    %61 = vector.shape_cast %60 : vector<16xf32> to vector<16x1xf32>
    %cst_13 = arith.constant 3.200000e+01 : f32
    %62 = vector.broadcast %cst_13 : f32 to vector<16x1xf32>
    %63 = arith.divf %61, %62 : vector<16x1xf32>
    %64 = vector.broadcast %56 : vector<16x1xf32> to vector<16x32xf32>
    %65 = arith.subf %50, %64 : vector<16x32xf32>
    %cst_14 = arith.constant 9.99999974E-6 : f32
    %66 = vector.broadcast %cst_14 : f32 to vector<16x1xf32>
    %67 = arith.addf %63, %66 : vector<16x1xf32>
    %68 = math.rsqrt %67 : vector<16x1xf32>
    %69 = vector.broadcast %68 : vector<16x1xf32> to vector<16x32xf32>
    %70 = arith.mulf %65, %69 : vector<16x32xf32>
    %71 = vector.broadcast %51 : vector<1x32xf32> to vector<16x32xf32>
    %72 = arith.mulf %70, %71 : vector<16x32xf32>
    %73 = vector.broadcast %52 : vector<1x32xf32> to vector<16x32xf32>
    %74 = arith.addf %72, %73 : vector<16x32xf32>
    %c0_15 = arith.constant 0 : index
    %c0_16 = arith.constant 0 : index
    %75 = vector.load %arg2[%c0_15, %c0_16] : memref<32x128xf32, #tpu.memory_space<vmem>>, vector<32x128xf32>
    %cst_17 = arith.constant dense<0.000000e+00> : vector<16x128xf32>
    %76 = tpu.matmul %74, %75, %cst_17 {dimension_numbers = #tpu.dot_dimension_numbers<[1], [0], [0], [1], [0, 0, 1, 1], [], []>} : vector<16x32xf32>, vector<32x128xf32>, vector<16x128xf32> -> vector<16x128xf32>
    %77 = vector.extract_strided_slice %2 {offsets = [1, 0], sizes = [1, 128], strides = [1, 1]} : vector<8x128xf32> to vector<1x128xf32>
    %78 = vector.broadcast %77 : vector<1x128xf32> to vector<16x128xf32>
    %79 = arith.addf %76, %78 : vector<16x128xf32>
    %cst_18 = arith.constant 0.000000e+00 : f32
    %80 = vector.broadcast %cst_18 : f32 to vector<16x128xf32>
    %81 = arith.maximumf %79, %80 : vector<16x128xf32>
    %c0_19 = arith.constant 0 : index
    %c0_20 = arith.constant 0 : index
    %82 = vector.load %arg3[%c0_19, %c0_20] : memref<128x32xf32, #tpu.memory_space<vmem>>, vector<128x32xf32>
    %cst_21 = arith.constant dense<0.000000e+00> : vector<16x32xf32>
    %83 = tpu.matmul %81, %82, %cst_21 {dimension_numbers = #tpu.dot_dimension_numbers<[1], [0], [0], [1], [0, 0, 1, 1], [], []>} : vector<16x128xf32>, vector<128x32xf32>, vector<16x32xf32> -> vector<16x32xf32>
    %84 = vector.extract_strided_slice %2 {offsets = [2, 0], sizes = [1, 32], strides = [1, 1]} : vector<8x128xf32> to vector<1x32xf32>
    %85 = vector.broadcast %84 : vector<1x32xf32> to vector<16x32xf32>
    %86 = arith.addf %83, %85 : vector<16x32xf32>
    %87 = arith.addf %86, %74 : vector<16x32xf32>
    %88 = vector.extract_strided_slice %2 {offsets = [5, 0], sizes = [1, 32], strides = [1, 1]} : vector<8x128xf32> to vector<1x32xf32>
    %89 = vector.extract_strided_slice %2 {offsets = [6, 0], sizes = [1, 32], strides = [1, 1]} : vector<8x128xf32> to vector<1x32xf32>
    %cst_22 = arith.constant dense<0.000000e+00> : vector<16xf32>
    %90 = vector.multi_reduction <add>, %87, %cst_22 [1] : vector<16x32xf32> to vector<16xf32>
    %91 = vector.shape_cast %90 : vector<16xf32> to vector<16x1xf32>
    %cst_23 = arith.constant 3.200000e+01 : f32
    %92 = vector.broadcast %cst_23 : f32 to vector<16x1xf32>
    %93 = arith.divf %91, %92 : vector<16x1xf32>
    %94 = vector.broadcast %93 : vector<16x1xf32> to vector<16x32xf32>
    %95 = arith.subf %87, %94 : vector<16x32xf32>
    %96 = arith.mulf %95, %95 : vector<16x32xf32>
    %cst_24 = arith.constant dense<0.000000e+00> : vector<16xf32>
    %97 = vector.multi_reduction <add>, %96, %cst_24 [1] : vector<16x32xf32> to vector<16xf32>
    %98 = vector.shape_cast %97 : vector<16xf32> to vector<16x1xf32>
    %cst_25 = arith.constant 3.200000e+01 : f32
    %99 = vector.broadcast %cst_25 : f32 to vector<16x1xf32>
    %100 = arith.divf %98, %99 : vector<16x1xf32>
    %101 = vector.broadcast %93 : vector<16x1xf32> to vector<16x32xf32>
    %102 = arith.subf %87, %101 : vector<16x32xf32>
    %cst_26 = arith.constant 9.99999974E-6 : f32
    %103 = vector.broadcast %cst_26 : f32 to vector<16x1xf32>
    %104 = arith.addf %100, %103 : vector<16x1xf32>
    %105 = math.rsqrt %104 : vector<16x1xf32>
    %106 = vector.broadcast %105 : vector<16x1xf32> to vector<16x32xf32>
    %107 = arith.mulf %102, %106 : vector<16x32xf32>
    %108 = vector.broadcast %88 : vector<1x32xf32> to vector<16x32xf32>
    %109 = arith.mulf %107, %108 : vector<16x32xf32>
    %110 = vector.broadcast %89 : vector<1x32xf32> to vector<16x32xf32>
    %111 = arith.addf %109, %110 : vector<16x32xf32>
    %c0_27 = arith.constant 0 : index
    %c0_28 = arith.constant 0 : index
    %112 = vector.load %arg5[%c0_27, %c0_28] : memref<16x32xf32, #tpu.memory_space<vmem>>, vector<16x32xf32>
    tpu.vector_store %arg5[%c0_27, %c0_28], %111 {strides = array<i32>} : memref<16x32xf32, #tpu.memory_space<vmem>>, vector<16x32xf32>,
    return
  }
}

</mosaic_0001>

<bundles_post_ra>
// kernel: encoder_block_forward.1
= control target key start
LH: loop header
LB: loop body
LE: loop exit
PB: predicated region body
PF: predicated region fallthrough
CT: control target
= control target key end

     0   :  { %vm32_vm0 = vcmask 261120   ;;  %s2548_s0 = inlined_call_operand.vmem [shape: f32[16,32], index: 0, kind: input, shape index: {}]   ;;  %s2549_s1 = inlined_call_operand.vmem [shape: f32[32,128], index: 1, kind: input, shape index: {}]   ;;  %s2550_s2 = inlined_call_operand.vmem [shape: f32[32,128], index: 2, kind: input, shape index: {}]   ;;  %s2551_s3 = inlined_call_operand.vmem [shape: f32[128,32], index: 3, kind: input, shape index: {}]   ;;  %s2552_s4 = inlined_call_operand.vmem [shape: f32[8,128], index: 4, kind: input, shape index: {}]   ;;  %s2553_s5 = inlined_call_operand.hbm [shape: f32[16,32], index: 5, kind: output, shape index: {}]  }
   0x1   :  { %v2218_v0 = vld [vmem:[%s2549_s1 + $0x18] sm:$0xff]  ;;  %v2223_v1 = vld [vmem:[%s2549_s1 + $0x10] sm:$0xff]  ;;  %v2229_v2 = vld [vmem:[%s2548_s0] sm:$0xff] }
   0x2   :  { %1949 = vmatprep.subr.mxu1 %v2218_v0  ;;  %v2235_v3 = vld [vmem:[%s2549_s1 + $0x8] sm:$0xff]  ;;  %1957 = vmatprep.mubr.msk.f32.mxu1 %vm32_vm0, %v2229_v2 }
   0x3   :  { %1950 = vmatpush3.msra.mxu1 %v2218_v0 }
   0x4   :  { %10 = vsyncpa [#allocation3], 0  ;;  %1951 = vmatprep.subr.mxu1 %v2223_v1  ;;  %v2244_v4 = vld [vmem:[%s2549_s1] sm:$0xff]  ;;  %v2251_v5 = vld [vmem:[%s2548_s0 + $0x8] sm:$0xff]  ;;  %v28_v6 = vlaneseq  ;;  %v2172_v12 = vmov 0.0   ;;  %s2173_s0 = smov 112  }
   0x5   :  { %1952 = vmatpush3.msra.mxu1 %v2223_v1  ;;  %v2263_v9 = vld [vmem:[%s2552_s4] sm:$0xff]  ;;  %1970 = vmatprep.subr.mxu0 %v2172_v12  ;;  %s2174_s6 = smov 120   ;;  %vm2175_vm1 = vmmov 0   ;;  %s2176_s4 = smov 104   ;;  %vm130_vm2 = vcmask 64512   ;;  %vm1459_vm3 = vcmask 130048  }
   0x6   :  { %1953 = vmatprep.subr.mxu1 %v2235_v3  ;;  %v2257_v7 = vshrl.u32 %v28_v6, 7  ;;  %1972 = vmatprep.mubr.msk.f32.mxu0 %vm2175_vm1, %v2172_v12  ;;  %s2177_s7 = smov 96   ;;  %s2178_s8 = smov 64   ;;  %vm1462_vm4 = vcmask 195584  }
   0x7   :  { %1954 = vmatpush3.msra.mxu1 %v2235_v3  ;;  %s2179_s9 = smov 32   ;;  %s2180_s10 = smov 16  }
   0x8   :  { %1955 = vmatprep.subr.mxu1 %v2244_v4  ;;  %v30_v8 = vsub.s32 0, %v2257_v7  ;;  %s2181_s11 = smov 8   ;;  %s2182_s12 = smov 24  }
   0x9   :  { %1956 = vmatpush3.msra.mxu1 %v2244_v4 }
   0xa   :  { %1958 = vmatmul.mubr.msk.f32.vlgmr.msra.gmra.mxu1 %vm32_vm0, %v2251_v5  ;;  %v2266_v11 = vrot.slane %v2263_v9, %v30_v8  ;;  %1960 = vmatprep.subr.mxu1 %v2172_v12 }
   0xb   :  { %1962 = vmatprep.mubr.msk.f32.mxu1 %vm2175_vm1, %v2172_v12 }
  0xca   :  { %v1959_v10 = vpop.f32.mrf.mxu1 }
  0xcb   :  { %v2280_v15 = vadd.f32 %v1959_v10, %v2266_v11 }
  0xcc   :  { %v105_v13 = vpop.f32.mrf.mxu1 }
  0xcd   :  { %v2271_v14 = vadd.f32 %v105_v13, %v2266_v11 }
  0xcf   :  { %120 = vrot.lane.b32.xlu1 %v2271_v14, %s2173_s0  ;;  %116 = vrot.lane.b32.xlu0 %v2271_v14, %s2174_s6 }
  0xd3   :  { %122 = vrot.lane.b32.xlu1 %v2280_v15, %s2173_s0  ;;  %118 = vrot.lane.b32.xlu0 %v2280_v15, %s2174_s6 }
  0xd7   :  { %126 = vrot.lane.b32.xlu1 %v2280_v15, %s2176_s4  ;;  %124 = vrot.lane.b32.xlu0 %v2271_v14, %s2176_s4 }
  0xdb   :  { %205 = vrot.lane.b32.xlu1 %v2280_v15, %s2177_s7  ;;  %128 = vrot.lane.b32.xlu0 %v2271_v14, %s2177_s7 }
 0x141   :  { %v2288_v16 = vpop.permute.xlu1 %120  ;;  %v2290_v17 = vpop.permute.xlu0 %116 }
 0x142   :  { %281 = vrot.lane.b32.xlu0 %v2290_v17, %s2177_s7 }
 0x145   :  { %v2293_v18 = vpop.permute.xlu1 %122  ;;  %v2295_v19 = vpop.permute.xlu0 %118 }
 0x146   :  { %433 = vrot.lane.b32.xlu0 %v2288_v16, %s2177_s7  ;;  %357 = vrot.lane.b32.xlu1 %v2295_v19, %s2177_s7 }
 0x149   :  { %v2299_v20 = vpop.permute.xlu0 %124  ;;  %v2303_v21 = vpop.permute.xlu1 %126 }
 0x14a   :  { %509 = vrot.lane.b32.xlu1 %v2293_v18, %s2177_s7  ;;  %585 = vrot.lane.b32.xlu0 %v2299_v20, %s2177_s7 }
 0x14d   :  { %v129_v22 = vpop.permute.xlu0 %128  ;;  %v206_v23 = vpop.permute.xlu1 %205 }
 0x14e   :  { %661 = vrot.lane.b32.xlu1 %v2303_v21, %s2177_s7  ;;  %1961 = vmatpush3.xpose.msk.msra.mxu1 %vm130_vm2, %v129_v22 }
 0x14f   :  { %1965 = vmatprep.subr.mxu1 %v2172_v12 }
 0x151   :  { %1963 = vmatmul.mubr.msk.f32.vlgmr.msra.gmra.mxu1 %vm130_vm2, %v2271_v14 }
 0x152   :  { %1966 = vmatpush3.xpose.msk.msra.mxu1 %vm130_vm2, %v206_v23  ;;  %1967 = vmatprep.mubr.msk.f32.mxu1 %vm2175_vm1, %v2172_v12 }
 0x153   :  { %1975 = vmatprep.subr.mxu1 %v2172_v12 }
 0x155   :  { %1968 = vmatmul.mubr.msk.f32.vlgmr.msra.gmra.mxu1 %vm130_vm2, %v2280_v15 }
 0x156   :  { %1977 = vmatprep.mubr.msk.f32.mxu1 %vm2175_vm1, %v2172_v12 }
 0x1b4   :  { %v282_v24 = vpop.permute.xlu0 %281 }
 0x1b5   :  { %1971 = vmatpush3.xpose.msk.msra.mxu0 %vm130_vm2, %v282_v24 }
 0x1b6   :  { %1980 = vmatprep.subr.mxu0 %v2172_v12 }
 0x1b8   :  { %v358_v25 = vpop.permute.xlu1 %357  ;;  %1973 = vmatmul.mubr.msk.f32.vlgmr.msra.gmra.mxu0 %vm130_vm2, %v2290_v17  ;;  %v434_v26 = vpop.permute.xlu0 %433 }
 0x1b9   :  { %1976 = vmatpush3.xpose.msk.msra.mxu1 %vm130_vm2, %v358_v25  ;;  %1981 = vmatpush3.xpose.msk.msra.mxu0 %vm130_vm2, %v434_v26 }
 0x1ba   :  { %1982 = vmatprep.mubr.msk.f32.mxu0 %vm2175_vm1, %v2172_v12  ;;  %1985 = vmatprep.subr.mxu1 %v2172_v12 }
 0x1bb   :  { %1990 = vmatprep.subr.mxu0 %v2172_v12 }
 0x1bc   :  { %v510_v27 = vpop.permute.xlu1 %509  ;;  %1978 = vmatmul.mubr.msk.f32.vlgmr.msra.gmra.mxu1 %vm130_vm2, %v2295_v19  ;;  %1983 = vmatmul.mubr.msk.f32.vlgmr.msra.gmra.mxu0 %vm130_vm2, %v2288_v16  ;;  %v586_v28 = vpop.permute.xlu0 %585 }
 0x1bd   :  { %1986 = vmatpush3.xpose.msk.msra.mxu1 %vm130_vm2, %v510_v27  ;;  %1991 = vmatpush3.xpose.msk.msra.mxu0 %vm130_vm2, %v586_v28 }
 0x1be   :  { %1987 = vmatprep.mubr.msk.f32.mxu1 %vm2175_vm1, %v2172_v12  ;;  %1992 = vmatprep.mubr.msk.f32.mxu0 %vm2175_vm1, %v2172_v12 }
 0x1bf   :  { %1995 = vmatprep.subr.mxu1 %v2172_v12  ;;  %2000 = vmatprep.subr.mxu0 %v2172_v12 }
 0x1c0   :  { %v662_v29 = vpop.permute.xlu1 %661  ;;  %1988 = vmatmul.mubr.msk.f32.vlgmr.msra.gmra.mxu1 %vm130_vm2, %v2293_v18  ;;  %1993 = vmatmul.mubr.msk.f32.vlgmr.msra.gmra.mxu0 %vm130_vm2, %v2299_v20 }
 0x1c1   :  { %1996 = vmatpush3.xpose.msk.msra.mxu1 %vm130_vm2, %v662_v29  ;;  %1997 = vmatprep.mubr.msk.f32.mxu1 %vm2175_vm1, %v2172_v12 }
 0x1c2   :  { %2005 = vmatprep.subr.mxu1 %v2172_v12  ;;  %2002 = vmatprep.mubr.msk.f32.mxu0 %vm2175_vm1, %v2172_v12 }
 0x1c4   :  { %1998 = vmatmul.mubr.msk.f32.vlgmr.msra.gmra.mxu1 %vm130_vm2, %v2303_v21 }
 0x1c5   :  { %2007 = vmatprep.mubr.msk.f32.mxu1 %vm2175_vm1, %v2172_v12 }
 0x211   :  { %v201_v30 = vpop.f32.mrf.mxu1 }
 0x212   :  { %v737_v31 = vsel %vm130_vm2, %v201_v30, -inf }
 0x213   :  { %738 = vmax.xlane.f32.xlu0 %v737_v31  ;;  %v1964_v32 = vpop.f32.mrf.mxu1 }
 0x215   :  { %v277_v33 = vpop.f32.mrf.mxu1 }
 0x216   :  { %v740_v34 = vsel %vm130_vm2, %v277_v33, -inf }
 0x217   :  { %741 = vmax.xlane.f32.xlu1 %v740_v34  ;;  %v1969_v35 = vpop.f32.mrf.mxu1 }
 0x278   :  { %v353_v36 = vpop.f32.mrf.mxu0 }
 0x279   :  { %v743_v37 = vsel %vm130_vm2, %v353_v36, -inf }
 0x27a   :  { %744 = vmax.xlane.f32.xlu0 %v743_v37  ;;  %v1974_v38 = vpop.f32.mrf.mxu0 }
 0x27c   :  { %v429_v39 = vpop.f32.mrf.mxu1  ;;  %v505_v40 = vpop.f32.mrf.mxu0 }
 0x27d   :  { %v746_v41 = vsel %vm130_vm2, %v429_v39, -inf  ;;  %v749_v42 = vsel %vm130_vm2, %v505_v40, -inf }
 0x27e   :  { %v1979_v43 = vpop.f32.mrf.mxu1  ;;  %747 = vmax.xlane.f32.xlu0 %v746_v41  ;;  %750 = vmax.xlane.f32.xlu1 %v749_v42  ;;  %v1984_v44 = vpop.f32.mrf.mxu0 }
 0x280   :  { %v581_v45 = vpop.f32.mrf.mxu1  ;;  %v657_v46 = vpop.f32.mrf.mxu0 }
 0x281   :  { %v752_v47 = vsel %vm130_vm2, %v581_v45, -inf  ;;  %v755_v48 = vsel %vm130_vm2, %v657_v46, -inf }
 0x282   :  { %v1989_v49 = vpop.f32.mrf.mxu1  ;;  %753 = vmax.xlane.f32.xlu0 %v752_v47  ;;  %756 = vmax.xlane.f32.xlu1 %v755_v48  ;;  %v1994_v50 = vpop.f32.mrf.mxu0 }
 0x284   :  { %v733_v51 = vpop.f32.mrf.mxu1 }
 0x285   :  { %v758_v52 = vsel %vm130_vm2, %v733_v51, -inf }
 0x286   :  { %v1999_v53 = vpop.f32.mrf.mxu1  ;;  %759 = vmax.xlane.f32.xlu0 %v758_v52 }
 0x293   :  { %825 = vrot.lane.b32.xlu1 %v2271_v14, %s2178_s8 }
 0x297   :  { %977 = vrot.lane.b32.xlu1 %v2290_v17, %s2178_s8 }
 0x29b   :  { %1053 = vrot.lane.b32.xlu1 %v2295_v19, %s2178_s8 }
 0x29c   :  { %901 = vrot.lane.b32.xlu0 %v2280_v15, %s2178_s8  ;;  %v739_v56 = vpop.xlane.xlu0 %738 }
 0x29d   :  { %v761_v57 = vsub.f32 %v201_v30, %v739_v56 }
 0x29f   :  { %1205 = vrot.lane.b32.xlu1 %v2293_v18, %s2178_s8  ;;  %v769_v59 = vmul.f32 1.442695, %v761_v57 }
 0x2a0   :  { %1129 = vrot.lane.b32.xlu0 %v2288_v16, %s2178_s8  ;;  %v742_v54 = vpop.xlane.xlu1 %741 }
 0x2a1   :  { %v762_v55 = vsub.f32 %v277_v33, %v742_v54 }
 0x2a3   :  { %v771_v58 = vmul.f32 1.442695, %v762_v55 }
 0x2a5   :  { %2110 = vpow2.f32 %v771_v58 }
 0x2a6   :  { %2112 = vpow2.f32 %v769_v59 }
 0x2b2   :  { %v2374_v60 = vpop.eup %2110 }
 0x2b3   :  { %v788_v61 = vsel %vm130_vm2, %v2374_v60, 0.0  ;;  %v2378_v62 = vpop.eup %2112 }
 0x2b4   :  { %v785_v63 = vsel %vm130_vm2, %v2378_v62, 0.0 }
 0x2bf   :  { %789 = vadd.xlane.f32.xlu0 %v788_v61 }
 0x2c3   :  { %786 = vadd.xlane.f32.xlu1 %v785_v63 }
 0x303   :  { %v745_v6 = vpop.xlane.xlu0 %744 }
 0x304   :  { %v763_v8 = vsub.f32 %v353_v36, %v745_v6 }
 0x306   :  { %v773_v10 = vmul.f32 1.442695, %v763_v8 }
 0x307   :  { %v751_v13 = vpop.xlane.xlu1 %750  ;;  %v748_v14 = vpop.xlane.xlu0 %747 }
 0x308   :  { %2114 = vpow2.f32 %v773_v10  ;;  %v765_v15 = vsub.f32 %v505_v40, %v751_v13  ;;  %v764_v16 = vsub.f32 %v429_v39, %v748_v14 }
 0x30a   :  { %v777_v17 = vmul.f32 1.442695, %v765_v15  ;;  %v775_v18 = vmul.f32 1.442695, %v764_v16 }
 0x30b   :  { %v757_v19 = vpop.xlane.xlu1 %756  ;;  %v754_v22 = vpop.xlane.xlu0 %753 }
 0x30c   :  { %2116 = vpow2.f32 %v777_v17  ;;  %v767_v23 = vsub.f32 %v657_v46, %v757_v19  ;;  %v766_v24 = vsub.f32 %v581_v45, %v754_v22 }
 0x30d   :  { %2118 = vpow2.f32 %v775_v18 }
 0x30e   :  { %v781_v25 = vmul.f32 1.442695, %v767_v23  ;;  %v779_v26 = vmul.f32 1.442695, %v766_v24 }
 0x30f   :  { %v826_v27 = vpop.permute.xlu1 %825  ;;  %v760_v28 = vpop.xlane.xlu0 %759 }
 0x310   :  { %2120 = vpow2.f32 %v781_v25  ;;  %v768_v29 = vsub.f32 %v733_v51, %v760_v28  ;;  %2001 = vmatpush3.msra.mxu0 %v826_v27 }
 0x311   :  { %2122 = vpow2.f32 %v779_v26  ;;  %2010 = vmatprep.subr.mxu0 %v2172_v12 }
 0x312   :  { %v783_v30 = vmul.f32 1.442695, %v768_v29 }
 0x313   :  { %v902_v31 = vpop.permute.xlu0 %901  ;;  %v978_v44 = vpop.permute.xlu1 %977 }
 0x314   :  { %2124 = vpow2.f32 %v783_v30  ;;  %2006 = vmatpush3.msra.mxu1 %v902_v31 }
 0x315   :  { %v2115_v32 = vpop.eup %2114  ;;  %2015 = vmatprep.subr.mxu1 %v2172_v12 }
 0x316   :  { %v791_v33 = vsel %vm130_vm2, %v2115_v32, 0.0 }
 0x317   :  { %792 = vadd.xlane.f32.xlu1 %v791_v33  ;;  %v1054_v45 = vpop.permute.xlu1 %1053  ;;  %v1130_v46 = vpop.permute.xlu0 %1129 }
 0x319   :  { %v2117_v34 = vpop.eup %2116 }
 0x31a   :  { %v2119_v35 = vpop.eup %2118  ;;  %v797_v36 = vsel %vm130_vm2, %v2117_v34, 0.0 }
 0x31b   :  { %798 = vadd.xlane.f32.xlu1 %v797_v36  ;;  %v794_v37 = vsel %vm130_vm2, %v2119_v35, 0.0  ;;  %v1206_v47 = vpop.permute.xlu1 %1205 }
 0x31c   :  { %795 = vadd.xlane.f32.xlu0 %v794_v37 }
 0x31d   :  { %v2387_v38 = vpop.eup %2120 }
 0x31e   :  { %v2389_v39 = vpop.eup %2122  ;;  %v803_v40 = vsel %vm130_vm2, %v2387_v38, 0.0 }
 0x31f   :  { %804 = vadd.xlane.f32.xlu1 %v803_v40  ;;  %v800_v41 = vsel %vm130_vm2, %v2389_v39, 0.0 }
 0x320   :  { %801 = vadd.xlane.f32.xlu0 %v800_v41 }
 0x321   :  { %v2395_v42 = vpop.eup %2124 }
 0x322   :  { %v806_v43 = vsel %vm130_vm2, %v2395_v42, 0.0 }
 0x324   :  { %807 = vadd.xlane.f32.xlu0 %v806_v43 }
 0x330   :  { %1357 = vrot.lane.b32.xlu1 %v2303_v21, %s2178_s8 }
 0x334   :  { %1473 = vrot.lane.b32.xlu1 %v2223_v1, %s2179_s9 }
 0x338   :  { %1471 = vrot.lane.b32.xlu1 %v2235_v3, %s2179_s9 }
 0x33a   :  { %1281 = vrot.lane.b32.xlu0 %v2299_v20, %s2178_s8 }
 0x33e   :  { %1475 = vrot.lane.b32.xlu0 %v2218_v0, %s2179_s9 }
 0x348   :  { %v790_v48 = vpop.xlane.xlu0 %789 }
 0x349   :  { %2126 = vrcp.f32 %v790_v48 }
 0x34c   :  { %v787_v49 = vpop.xlane.xlu1 %786 }
 0x34d   :  { %2128 = vrcp.f32 %v787_v49 }
 0x356   :  { %v2127_v50 = vpop.eup %2126 }
 0x357   :  { %v818_v51 = vmul.f32 %v2127_v50, %v2374_v60 }
 0x359   :  { %2008 = vmatmul.mubr.msk.f32.vlgmr.msra.gmra.mxu1 %vm130_vm2, %v818_v51 }
 0x35a   :  { %v2129_v52 = vpop.eup %2128  ;;  %2016 = vmatpush3.msra.mxu1 %v1054_v45  ;;  %2017 = vmatprep.mubr.msk.f32.mxu1 %vm2175_vm1, %v2172_v12 }
 0x35b   :  { %v817_v20 = vmul.f32 %v2129_v52, %v2378_v62  ;;  %2025 = vmatprep.subr.mxu1 %v2172_v12 }
 0x35d   :  { %2003 = vmatmul.mubr.msk.f32.vlgmr.msra.gmra.mxu0 %vm130_vm2, %v817_v20 }
 0x35e   :  { %2011 = vmatpush3.msra.mxu0 %v978_v44  ;;  %2012 = vmatprep.mubr.msk.f32.mxu0 %vm2175_vm1, %v2172_v12 }
 0x35f   :  { %2020 = vmatprep.subr.mxu0 %v2172_v12 }
 0x3a0   :  { %v793_v21 = vpop.xlane.xlu1 %792 }
 0x3a1   :  { %2130 = vrcp.f32 %v793_v21 }
 0x3a4   :  { %v799_v53 = vpop.xlane.xlu1 %798 }
 0x3a5   :  { %2132 = vrcp.f32 %v799_v53  ;;  %v796_v54 = vpop.xlane.xlu0 %795 }
 0x3a6   :  { %2134 = vrcp.f32 %v796_v54 }
 0x3a8   :  { %v805_v55 = vpop.xlane.xlu1 %804 }
 0x3a9   :  { %2136 = vrcp.f32 %v805_v55  ;;  %v802_v56 = vpop.xlane.xlu0 %801 }
 0x3aa   :  { %2138 = vrcp.f32 %v802_v56 }
 0x3ac   :  { %v1358_v10 = vpop.permute.xlu1 %1357 }
 0x3ad   :  { %v808_v57 = vpop.xlane.xlu0 %807 }
 0x3ae   :  { %v2131_v58 = vpop.eup %2130  ;;  %2140 = vrcp.f32 %v808_v57 }
 0x3af   :  { %v819_v59 = vmul.f32 %v2131_v58, %v2115_v32 }
 0x3b0   :  { %v1474_v15 = vpop.permute.xlu1 %1473 }
 0x3b1   :  { %2013 = vmatmul.mubr.msk.f32.vlgmr.msra.gmra.mxu0 %vm130_vm2, %v819_v59  ;;  %v1282_v61 = vpop.permute.xlu0 %1281 }
 0x3b2   :  { %v2133_v1 = vpop.eup %2132  ;;  %2021 = vmatpush3.msra.mxu0 %v1130_v46  ;;  %2022 = vmatprep.mubr.msk.f32.mxu0 %vm2175_vm1, %v2172_v12 }
 0x3b3   :  { %v2135_v0 = vpop.eup %2134  ;;  %2030 = vmatprep.subr.mxu0 %v2172_v12  ;;  %v821_v3 = vmul.f32 %v2133_v1, %v2117_v34 }
 0x3b4   :  { %v820_v60 = vmul.f32 %v2135_v0, %v2119_v35  ;;  %v1472_v17 = vpop.permute.xlu1 %1471  ;;  %v1610_v0 = vld [vmem:[%s2550_s2 + $0x18] sm:$0xff] }
 0x3b5   :  { %2023 = vmatmul.mubr.msk.f32.vlgmr.msra.gmra.mxu0 %vm130_vm2, %v821_v3  ;;  %v1476_v16 = vpop.permute.xlu0 %1475  ;;  %v1609_v3 = vld [vmem:[%s2550_s2 + $0x10] sm:$0xff] }
 0x3b6   :  { %v2137_v62 = vpop.eup %2136  ;;  %2018 = vmatmul.mubr.msk.f32.vlgmr.msra.gmra.mxu1 %vm130_vm2, %v820_v60  ;;  %2031 = vmatpush3.msra.mxu0 %v1282_v61  ;;  %v1608_v60 = vld [vmem:[%s2550_s2 + $0x8] sm:$0xff]  ;;  %v1607_v61 = vld [vmem:[%s2550_s2] sm:$0xff] }
 0x3b7   :  { %v2139_v63 = vpop.eup %2138  ;;  %2026 = vmatpush3.msra.mxu1 %v1206_v47  ;;  %2027 = vmatprep.mubr.msk.f32.mxu1 %vm2175_vm1, %v2172_v12  ;;  %v823_v6 = vmul.f32 %v2137_v62, %v2387_v38  ;;  %v1713_v62 = vld [vmem:[%s2551_s3 + $0x78] sm:$0xff] }
 0x3b8   :  { %2032 = vmatprep.mubr.msk.f32.mxu0 %vm2175_vm1, %v2172_v12  ;;  %2035 = vmatprep.subr.mxu1 %v2172_v12  ;;  %v822_v8 = vmul.f32 %v2139_v63, %v2389_v39  ;;  %v1712_v63 = vld [vmem:[%s2551_s3 + $0x70] sm:$0xff] }
 0x3b9   :  { %2033 = vmatmul.mubr.msk.f32.vlgmr.msra.gmra.mxu0 %vm130_vm2, %v823_v6  ;;  %2062 = vmatprep.subr.mxu0 %v1713_v62  ;;  %v1711_v6 = vld [vmem:[%s2551_s3 + $0x68] sm:$0xff] }
 0x3ba   :  { %2028 = vmatmul.mubr.msk.f32.vlgmr.msra.gmra.mxu1 %vm130_vm2, %v822_v8  ;;  %2063 = vmatpush3.msra.mxu0 %v1713_v62  ;;  %v1710_v8 = vld [vmem:[%s2551_s3 + $0x60] sm:$0xff] }
 0x3bb   :  { %v2141_v13 = vpop.eup %2140  ;;  %2036 = vmatpush3.msra.mxu1 %v1358_v10  ;;  %2037 = vmatprep.mubr.msk.f32.mxu1 %vm2175_vm1, %v2172_v12  ;;  %v1709_v10 = vld [vmem:[%s2551_s3 + $0x58] sm:$0xff] }
 0x3bc   :  { %v824_v14 = vmul.f32 %v2141_v13, %v2395_v42  ;;  %2040 = vmatprep.subr.mxu1 %v1476_v16  ;;  %2064 = vmatprep.subr.mxu0 %v1712_v63  ;;  %v1708_v13 = vld [vmem:[%s2551_s3 + $0x50] sm:$0xff] }
 0x3bd   :  { %2065 = vmatpush3.msra.mxu0 %v1712_v63 }
 0x3be   :  { %2038 = vmatmul.mubr.msk.f32.vlgmr.msra.gmra.mxu1 %vm130_vm2, %v824_v14  ;;  %2066 = vmatprep.subr.mxu0 %v1711_v6  ;;  %v1707_v14 = vld [vmem:[%s2551_s3 + $0x48] sm:$0xff] }
 0x3bf   :  { %2041 = vmatpush3.msra.mxu1 %v1476_v16  ;;  %2067 = vmatpush3.msra.mxu0 %v1711_v6  ;;  %v1705_v16 = vld [vmem:[%s2551_s3 + $0x38] sm:$0xff] }
 0x3c0   :  { %2042 = vmatprep.subr.mxu1 %v1474_v15  ;;  %2068 = vmatprep.subr.mxu0 %v1710_v8 }
 0x3c1   :  { %2043 = vmatpush3.msra.mxu1 %v1474_v15  ;;  %2069 = vmatpush3.msra.mxu0 %v1710_v8  ;;  %v1706_v15 = vld [vmem:[%s2551_s3 + $0x40] sm:$0xff] }
 0x3c2   :  { %2044 = vmatprep.subr.mxu1 %v1472_v17  ;;  %2070 = vmatprep.subr.mxu0 %v1709_v10 }
 0x3c3   :  { %2045 = vmatpush3.msra.mxu1 %v1472_v17  ;;  %2071 = vmatpush3.msra.mxu0 %v1709_v10  ;;  %v1704_v17 = vld [vmem:[%s2551_s3 + $0x30] sm:$0xff] }
 0x3c4   :  { %2072 = vmatprep.subr.mxu0 %v1708_v13 }
 0x3c5   :  { %2073 = vmatpush3.msra.mxu0 %v1708_v13 }
 0x3c6   :  { %2074 = vmatprep.subr.mxu0 %v1707_v14 }
 0x3c7   :  { %2075 = vmatpush3.msra.mxu0 %v1707_v14  ;;  %v1823_v14 = vsub.s32 5, %v2257_v7 }
 0x3c8   :  { %2076 = vmatprep.subr.mxu0 %v1706_v15 }
 0x3c9   :  { %2077 = vmatpush3.msra.mxu0 %v1706_v15  ;;  %v1829_v15 = vsub.s32 6, %v2257_v7 }
 0x3ca   :  { %2078 = vmatprep.subr.mxu0 %v1705_v16 }
 0x3cb   :  { %2079 = vmatpush3.msra.mxu0 %v1705_v16  ;;  %v1824_v16 = vrot.slane %v2263_v9, %v1823_v14 }
 0x3cc   :  { %2080 = vmatprep.subr.mxu0 %v1704_v17 }
 0x3cd   :  { %2081 = vmatpush3.msra.mxu0 %v1704_v17 }
 0x419   :  { %v973_v18 = vpop.f32.mrf.mxu1 }
 0x41b   :  { %v2009_v19 = vpop.f32.mrf.mxu1 }
 0x41c   :  { %v1702_v19 = vld [vmem:[%s2551_s3 + $0x20] sm:$0xff] }
 0x41d   :  { %v897_v22 = vpop.f32.mrf.mxu0 }
 0x41f   :  { %v2004_v23 = vpop.f32.mrf.mxu0 }
 0x471   :  { %v1049_v24 = vpop.f32.mrf.mxu0 }
 0x473   :  { %v2014_v25 = vpop.f32.mrf.mxu0 }
 0x475   :  { %v1201_v12 = vpop.f32.mrf.mxu0 }
 0x476   :  { %v1125_v26 = vpop.f32.mrf.mxu1  ;;  %1443 = vrot.lane.b32.xlu1 %v1201_v12, %s2180_s10 }
 0x477   :  { %1437 = vrot.lane.b32.xlu0 %v1125_v26, %s2181_s11  ;;  %v2024_v27 = vpop.f32.mrf.mxu0 }
 0x478   :  { %v2019_v28 = vpop.f32.mrf.mxu1  ;;  %v1597_v27 = vsub.s32 3, %v2257_v7 }
 0x479   :  { %v1353_v29 = vpop.f32.mrf.mxu0 }
 0x47a   :  { %v1277_v30 = vpop.f32.mrf.mxu1  ;;  %1451 = vrot.lane.b32.xlu1 %v1353_v29, %s2182_s12  ;;  %v1598_v29 = vrot.slane %v2263_v9, %v1597_v27 }
 0x47b   :  { %1435 = vrot.lane.b32.xlu0 %v1049_v24, %s2181_s11  ;;  %v2034_v31 = vpop.f32.mrf.mxu0 }
 0x47c   :  { %v2029_v32 = vpop.f32.mrf.mxu1 }
 0x47e   :  { %v1429_v33 = vpop.f32.mrf.mxu1 }
 0x47f   :  { %1445 = vrot.lane.b32.xlu0 %v1277_v30, %s2180_s10  ;;  %1453 = vrot.lane.b32.xlu1 %v1429_v33, %s2182_s12  ;;  %v1603_v30 = vsub.s32 4, %v2257_v7 }
 0x480   :  { %v2039_v34 = vpop.f32.mrf.mxu1 }
 0x483   :  { %1469 = vrot.lane.b32.xlu0 %v2244_v4, %s2179_s9 }
 0x487   :  { %1482 = vrot.lane.b32.xlu0 %v2266_v11, %s2179_s9 }
 0x4e8   :  { %v1444_v35 = vpop.permute.xlu1 %1443 }
 0x4e9   :  { %v1438_v36 = vpop.permute.xlu0 %1437 }
 0x4ea   :  { %v1458_v43 = vsel %vm130_vm2, %v973_v18, %v1438_v36  ;;  %v1703_v18 = vld [vmem:[%s2551_s3 + $0x28] sm:$0xff] }
 0x4eb   :  { %2082 = vmatprep.subr.mxu0 %v1703_v18 }
 0x4ec   :  { %v1452_v38 = vpop.permute.xlu1 %1451  ;;  %2083 = vmatpush3.msra.mxu0 %v1703_v18 }
 0x4ed   :  { %v1436_v37 = vpop.permute.xlu0 %1435  ;;  %2084 = vmatprep.subr.mxu0 %v1702_v19 }
 0x4ee   :  { %v1457_v39 = vsel %vm130_vm2, %v897_v22, %v1436_v37  ;;  %2085 = vmatpush3.msra.mxu0 %v1702_v19  ;;  %v1830_v19 = vrot.slane %v2263_v9, %v1829_v15 }
 0x4ef   :  { %v1460_v40 = vsel %vm1459_vm3, %v1457_v39, %v1444_v35  ;;  %v1604_v35 = vrot.slane %v2263_v9, %v1603_v30  ;;  %v1701_v39 = vld [vmem:[%s2551_s3 + $0x18] sm:$0xff] }
 0x4f0   :  { %v1463_v41 = vsel %vm1462_vm4, %v1460_v40, %v1452_v38  ;;  %2086 = vmatprep.subr.mxu0 %v1701_v39  ;;  %v1700_v40 = vld [vmem:[%s2551_s3 + $0x10] sm:$0xff] }
 0x4f1   :  { %2048 = vmatprep.mubr.msk.f32.mxu1 %vm32_vm0, %v1463_v41  ;;  %v1446_v42 = vpop.permute.xlu0 %1445  ;;  %v1454_v44 = vpop.permute.xlu1 %1453  ;;  %2087 = vmatpush3.msra.mxu0 %v1701_v39  ;;  %v1699_v41 = vld [vmem:[%s2551_s3 + $0x8] sm:$0xff] }
 0x4f2   :  { %v1461_v4 = vsel %vm1459_vm3, %v1458_v43, %v1446_v42  ;;  %2088 = vmatprep.subr.mxu0 %v1700_v40  ;;  %v1698_v42 = vld [vmem:[%s2551_s3] sm:$0xff]  ;;  %v1613_v43 = vsub.s32 1, %v2257_v7  ;;  %s2183_s3 = smov [#allocation2]  }
 0x4f3   :  { %v1464_v11 = vsel %vm1462_vm4, %v1461_v4, %v1454_v44  ;;  %2089 = vmatpush3.msra.mxu0 %v1700_v40  ;;  %s1840_s25 = sshll.u32 %s2183_s3, 4  ;;  %s1841_s25 = int_to_ptr.vmem [resolvable:$true] %s1840_s25 }
 0x4f4   :  { %2090 = vmatprep.subr.mxu0 %v1699_v41  ;;  %v1614_v44 = vrot.slane %v2263_v9, %v1613_v43  ;;  %s2150_s26 = scalar_lea.vmem %s1841_s25, 256  ;;  %p2155_p1 = scmp.lt.s32.totalorder %s1841_s25, %s1841_s25 }
 0x4f5   :  { %v1470_v45 = vpop.permute.xlu0 %1469  ;;  %2091 = vmatpush3.msra.mxu0 %v1699_v41  ;;  %p2151_p0 = scmp.ne.s32.totalorder %s1841_s25, %s2150_s26  ;;  %p2156_p2 = scmp.lt.s32.totalorder %s2150_s26, %s2150_s26 }
 0x4f6   :  { %2046 = vmatprep.subr.mxu1 %v1470_v45  ;;  %2092 = vmatprep.subr.mxu0 %v1698_v42 }
 0x4f7   :  { %2047 = vmatpush3.msra.mxu1 %v1470_v45  ;;  %2093 = vmatpush3.msra.mxu0 %v1698_v42  ;;  %p2157_p3 = por %p2156_p2, %p2155_p1 }
 0x4f8   :  { %2049 = vmatmul.mubr.msk.f32.vlgmr.msra.gmra.mxu1 %vm32_vm0, %v1464_v11  ;;  %2051 = vmatprep.subr.mxu1 %v1610_v0 }
 0x4f9   :  { %v1483_v46 = vpop.permute.xlu0 %1482  ;;  %2052 = vmatpush3.msra.mxu1 %v1610_v0  ;;  %p2158_p4 = pnand %p2157_p3, %p2151_p0 }
 0x4fa   :  { %2053 = vmatprep.subr.mxu1 %v1609_v3 }
 0x4fb   :  { %2054 = vmatpush3.msra.mxu1 %v1609_v3 }
 0x4fc   :  { %2055 = vmatprep.subr.mxu1 %v1608_v60 }
 0x4fd   :  { %2056 = vmatpush3.msra.mxu1 %v1608_v60 }
 0x4fe   :  { %2057 = vmatprep.subr.mxu1 %v1607_v61 }
 0x4ff   :  { %2058 = vmatpush3.msra.mxu1 %v1607_v61 }
 0x5b8   :  { %v2050_v47 = vpop.f32.mrf.mxu1 }
 0x5b9   :  { %v1563_v48 = vadd.f32 %v2050_v47, %v1483_v46 }
 0x5ba   :  { %v1557_v49 = vpop.f32.mrf.mxu1 }
 0x5bb   :  { %v1558_v50 = vadd.f32 %v1557_v49, %v1483_v46  ;;  %v1567_v51 = vadd.f32 %v1563_v48, %v2251_v5  ;;  %v1716_v49 = vsub.s32 2, %v2257_v7 }
 0x5bd   :  { %v1571_v52 = vsel %vm32_vm0, %v1567_v51, 0.0  ;;  %v1566_v20 = vadd.f32 %v1558_v50, %v2229_v2  ;;  %v1717_v50 = vrot.slane %v2263_v9, %v1716_v49 }
 0x5be   :  { %1572 = vadd.xlane.f32.xlu0 %v1571_v52 }
 0x5bf   :  { %v1568_v21 = vsel %vm32_vm0, %v1566_v20, 0.0 }
 0x5c0   :  { %1569 = vadd.xlane.f32.xlu1 %v1568_v21 }
 0x647   :  { %v1573_v53 = vpop.xlane.xlu0 %1572 }
 0x648   :  { %v1576_v54 = vmul.f32 0.03125, %v1573_v53 }
 0x649   :  { %v1570_v55 = vpop.xlane.xlu1 %1569 }
 0x64a   :  { %v2452_v56 = vsub.f32 %v1567_v51, %v1576_v54  ;;  %v1575_v57 = vmul.f32 0.03125, %v1570_v55 }
 0x64c   :  { %v2454_v58 = vsub.f32 %v1566_v20, %v1575_v57  ;;  %v1580_v59 = vmul.f32 %v2452_v56, %v2452_v56 }
 0x64e   :  { %v1584_v5 = vsel %vm32_vm0, %v1580_v59, 0.0  ;;  %v1579_v2 = vmul.f32 %v2454_v58, %v2454_v58 }
 0x64f   :  { %1585 = vadd.xlane.f32.xlu1 %v1584_v5 }
 0x650   :  { %v1581_v1 = vsel %vm32_vm0, %v1579_v2, 0.0 }
 0x651   :  { %1582 = vadd.xlane.f32.xlu0 %v1581_v1 }
 0x6d8   :  { %v1586_v22 = vpop.xlane.xlu1 %1585 }
 0x6d9   :  { %v1588_v23 = vmul.f32 0.03125, %v1586_v22 }
 0x6da   :  { %v1583_v24 = vpop.xlane.xlu0 %1582 }
 0x6db   :  { %v1590_v25 = vadd.f32 1e-05, %v1588_v23  ;;  %v1587_v12 = vmul.f32 0.03125, %v1583_v24 }
 0x6dd   :  { %2142 = vrsqrt.f32 %v1590_v25  ;;  %v1589_v26 = vadd.f32 1e-05, %v1587_v12 }
 0x6df   :  { %2144 = vrsqrt.f32 %v1589_v26 }
 0x6ea   :  { %v2143_v28 = vpop.eup %2142 }
 0x6eb   :  { %v1594_v31 = vmul.f32 %v2143_v28, %v2452_v56 }
 0x6ec   :  { %v2145_v32 = vpop.eup %2144 }
 0x6ed   :  { %v1593_v33 = vmul.f32 %v2145_v32, %v2454_v58  ;;  %v1600_v34 = vmul.f32 %v1598_v29, %v1594_v31 }
 0x6ef   :  { %v1599_v36 = vmul.f32 %v1598_v29, %v1593_v33  ;;  %v1606_v38 = vadd.f32 %v1604_v35, %v1600_v34 }
 0x6f1   :  { %v1605_v37 = vadd.f32 %v1604_v35, %v1599_v36 }
 0x6f3   :  { %2059 = vmatprep.mubr.msk.f32.mxu1 %vm32_vm0, %v1605_v37 }
 0x6f4   :  { %2060 = vmatmul.mubr.msk.f32.vlgmr.msra.gmra.mxu1 %vm32_vm0, %v1606_v38 }
 0x7b4   :  { %v2061_v4 = vpop.f32.mrf.mxu1 }
 0x7b5   :  { %v1693_v45 = vadd.f32 %v2061_v4, %v1614_v44 }
 0x7b6   :  { %v1687_v11 = vpop.f32.mrf.mxu1 }
 0x7b7   :  { %v1688_v46 = vadd.f32 %v1687_v11, %v1614_v44  ;;  %v1697_v48 = vmax.f32 %v1693_v45, 0.0 }
 0x7b9   :  { %v1696_v47 = vmax.f32 %v1688_v46, 0.0 }
 0x7bb   :  { %2094 = vmatprep.mubr.f32.mxu0 %v1696_v47 }
 0x7bc   :  { %2095 = vmatmul.mubr.f32.vlgmr.msra.gmra.mxu0 %v1697_v48 }
 0x87c   :  { %v2096_v51 = vpop.f32.mrf.mxu0 }
 0x87d   :  { %v1790_v52 = vadd.f32 %v2096_v51, %v1717_v50 }
 0x87e   :  { %v1784_v20 = vpop.f32.mrf.mxu0 }
 0x87f   :  { %v1785_v21 = vadd.f32 %v1784_v20, %v1717_v50  ;;  %v1794_v53 = vadd.f32 %v1790_v52, %v1606_v38 }
 0x881   :  { %v1798_v54 = vsel %vm32_vm0, %v1794_v53, 0.0  ;;  %v1793_v55 = vadd.f32 %v1785_v21, %v1605_v37 }
 0x882   :  { %1799 = vadd.xlane.f32.xlu1 %v1798_v54 }
 0x883   :  { %v1795_v56 = vsel %vm32_vm0, %v1793_v55, 0.0 }
 0x884   :  { %1796 = vadd.xlane.f32.xlu0 %v1795_v56 }
 0x90b   :  { %v1800_v57 = vpop.xlane.xlu1 %1799 }
 0x90c   :  { %v1802_v58 = vmul.f32 0.03125, %v1800_v57 }
 0x90d   :  { %v1797_v59 = vpop.xlane.xlu0 %1796 }
 0x90e   :  { %v1804_v5 = vsub.f32 %v1794_v53, %v1802_v58  ;;  %v1801_v2 = vmul.f32 0.03125, %v1797_v59 }
 0x910   :  { %v1803_v1 = vsub.f32 %v1793_v55, %v1801_v2  ;;  %v1806_v0 = vmul.f32 %v1804_v5, %v1804_v5 }
 0x912   :  { %v1810_v3 = vsel %vm32_vm0, %v1806_v0, 0.0  ;;  %v1805_v60 = vmul.f32 %v1803_v1, %v1803_v1 }
 0x913   :  { %1811 = vadd.xlane.f32.xlu1 %v1810_v3 }
 0x914   :  { %v1807_v61 = vsel %vm32_vm0, %v1805_v60, 0.0 }
 0x915   :  { %1808 = vadd.xlane.f32.xlu0 %v1807_v61 }
 0x99c   :  { %v1812_v62 = vpop.xlane.xlu1 %1811 }
 0x99d   :  { %v1814_v63 = vmul.f32 0.03125, %v1812_v62 }
 0x99e   :  { %v1809_v6 = vpop.xlane.xlu0 %1808 }
 0x99f   :  { %v1816_v8 = vadd.f32 1e-05, %v1814_v63  ;;  %v1813_v10 = vmul.f32 0.03125, %v1809_v6 }
 0x9a1   :  { %2146 = vrsqrt.f32 %v1816_v8  ;;  %v1815_v13 = vadd.f32 1e-05, %v1813_v10 }
 0x9a3   :  { %2148 = vrsqrt.f32 %v1815_v13 }
 0x9ae   :  { %v2147_v17 = vpop.eup %2146 }
 0x9af   :  { %v1820_v18 = vmul.f32 %v2147_v17, %v1804_v5 }
 0x9b0   :  { %v2149_v22 = vpop.eup %2148 }
 0x9b1   :  { %v1819_v23 = vmul.f32 %v2149_v22, %v1803_v1  ;;  %v1826_v24 = vmul.f32 %v1824_v16, %v1820_v18 }
 0x9b3   :  { %v1825_v25 = vmul.f32 %v1824_v16, %v1819_v23  ;;  %v1832_v12 = vadd.f32 %v1830_v19, %v1826_v24 }
 0x9b5   :  { %v1831_v26 = vadd.f32 %v1830_v19, %v1825_v25  ;;  %1834 = vst.msk [vmem:[#allocation2 + $0x8] sm:$0xff] %vm32_vm0, %v1832_v12 }
 0x9b7   :  { %1833 = vst.msk [vmem:[#allocation2] sm:$0xff] %vm32_vm0, %v1831_v26 }
 0x9b8   :  { %2161 = shalt.err (!%p2158_p4)
}
 0x9b9   :  { %s2184_s2 = smov 128  }
 0x9ba   :  { %1846 = dma.vmem_to_hbm [thread:$0]  %s1841_s25, 256, %s2553_s5, [#allocation3], %s2184_s2, %s2184_s2, %s2181_s11  }
 0x9bb   :  { %2170 = dma.done.wait [#allocation3], 256  }
 0x9bc   :  { %2171 = vsyncadd [#allocation3], 4294967040 }
 0x9bd   :  { %1850 = vsyncpa [#allocation3], 1 }

</bundles_post_ra>
